<compile_context>
chip_gen: v6e
topology: v6e:2x2x1
jax: 0.10.0
libtpu: 0.0.40
codegen_flags: <defaults>
</compile_context>

<pallas_src>
import functools

import jax
import jax.numpy as jnp
from jax.experimental import pallas as pl
from jax.experimental.pallas import tpu as pltpu


def _round_up(x, m):
    return ((x + m - 1) // m) * m


def _gnn_kernel(obj_ref, attr_in_ref, rela_ref, s_idx_ref, o_idx_ref, mask_ref,
                w_att_ref, b_att_ref, w1_ref, b1_ref, w2_ref, b2_ref,
                attr_out_ref, rela_out_ref):
    """One row-tile of the GNN forward.

    Per-grid-step (tiled) refs:
      attr_in_ref : (tile_bn, 2d) f32      rela_ref : (tile_be, d) f32
      s_idx_ref   : (tile_be, 1)  i32      o_idx_ref: (tile_be, 1) i32
      mask_ref    : (tile_be, 1)  f32
      attr_out_ref: (tile_bn, d)  f32      rela_out_ref: (tile_be, d) f32
    Resident (constant index_map, DMA'd once):
      obj_ref (BN_pad, d) in compute dtype; w_att (2d,d), w1 (2d,d), w2 (3d,d)
      in compute dtype; biases (1, d) f32.
    """
    cd = w1_ref.dtype                         # MXU operand dtype (f32 or bf16)
    i = pl.program_id(0)

    tile_bn = attr_in_ref.shape[0]
    tile_be = rela_ref.shape[0]
    bn_pad = obj_ref.shape[0]

    # Row tile of obj for the attr path (aligned dynamic slice of resident obj).
    row0 = pl.multiple_of(i * tile_bn, tile_bn)
    obj_tile = obj_ref[pl.ds(row0, tile_bn), :]          # (tile_bn, d), cd

    attr_in = attr_in_ref[...]                           # (tile_bn, 2d) f32
    rela = rela_ref[...]                                 # (tile_be, d)  f32
    mask = mask_ref[...]                                 # (tile_be, 1)  f32

    # ---- attr linear: self.att_vecs (f32 accumulation) -------------------
    attr_lin = (jnp.dot(attr_in.astype(cd), w_att_ref[...],
                        preferred_element_type=jnp.float32)
                + b_att_ref[...])                        # (tile_bn, d) f32

    # ---- gnn_attr: relu(cat([obj, attr_lin]) @ W1^T + b1) + attr_lin -----
    # single fused K=2d matmul (one MXU push/drain instead of two K=d dots)
    x1 = jnp.concatenate([obj_tile, attr_lin.astype(cd)], axis=-1)   # (tile_bn, 2d)
    h_attr = (jnp.dot(x1, w1_ref[...], preferred_element_type=jnp.float32)
              + b1_ref[...])
    attr_out_ref[...] = jnp.maximum(h_attr, 0.0) + attr_lin          # f32 epilogue

    # ---- gather s/o vectors: stacked one-hot MXU gather (per BE tile) ----
    so_idx = jnp.concatenate([s_idx_ref[...], o_idx_ref[...]], axis=0)  # (2T, 1)
    iota = jax.lax.broadcasted_iota(jnp.int32, (2 * tile_be, bn_pad), 1)
    so_oh = (iota == so_idx).astype(cd)                  # (2T, BN_pad), cd
    so_vecs = jnp.dot(so_oh, obj_ref[...],
                      preferred_element_type=jnp.float32)            # (2T, d) f32
    s_vecs = so_vecs[:tile_be]
    o_vecs = so_vecs[tile_be:]

    # ---- gnn_rela (rela_gnn_type == 0): one fused K=3d matmul ------------
    x2 = jnp.concatenate([s_vecs, rela, o_vecs], axis=-1).astype(cd)  # (T, 3d)
    h_rela = (jnp.dot(x2, w2_ref[...], preferred_element_type=jnp.float32)
              + b2_ref[...])
    rela_out_ref[...] = (jnp.maximum(h_rela, 0.0) + rela) * mask      # f32 epilogue


def init_params(key, d):
    """Deterministic parameter init matching the PyTorch module shapes."""
    ks = jax.random.split(key, 6)
    scale = 0.05
    return {
        # att_vecs: Linear(2d, d)  -> weight (d, 2d), bias (d,)
        "w_att": scale * jax.random.normal(ks[0], (d, 2 * d), jnp.float32),
        "b_att": scale * jax.random.normal(ks[1], (d,), jnp.float32),
        # gnn_attr[0]: Linear(2d, d)
        "w1": scale * jax.random.normal(ks[2], (d, 2 * d), jnp.float32),
        "b1": scale * jax.random.normal(ks[3], (d,), jnp.float32),
        # gnn_rela[0]: Linear(3d, d)   (rela_gnn_type == 0)
        "w2": scale * jax.random.normal(ks[4], (d, 3 * d), jnp.float32),
        "b2": scale * jax.random.normal(ks[5], (d,), jnp.float32),
    }


@functools.partial(jax.jit, static_argnames=("compute_dtype", "row_tile"))
def gnn_forward(params, obj_vecs, attr_vecs, rela_vecs, edges, rela_masks,
                *, compute_dtype=jnp.float32, row_tile=256):
    B, No, d = obj_vecs.shape
    Nr = rela_vecs.shape[1]
    BN, BE = B * No, B * Nr

    # ---- feat_3d_to_2d glue (reshapes + batch offsets on edges) ----------
    obj2d = obj_vecs.reshape(BN, d)
    attr2d = attr_vecs.reshape(BN, 2 * d)
    rela2d = rela_vecs.reshape(BE, d)
    offsets = (jnp.arange(B, dtype=jnp.int32) * No)[:, None, None]
    edges2d = (edges.astype(jnp.int32) + offsets).reshape(BE, 2)
    # Clamp so padded / out-of-range indices gather a real row (matches the
    # clamping behavior of the JAX reference instead of a silent all-zero row).
    edges2d = jnp.clip(edges2d, 0, BN - 1)
    s_idx = edges2d[:, 0:1]
    o_idx = edges2d[:, 1:2]
    mask2d = rela_masks.reshape(BE, 1).astype(jnp.float32)

    # ---- row tiling: one common grid over BN tiles and BE tiles -----------
    G = max(1, -(-max(BN, BE) // row_tile))
    tile_bn = _round_up(-(-BN // G), 8)
    tile_be = _round_up(-(-BE // G), 8)
    BN_pad, BE_pad = G * tile_bn, G * tile_be

    def pad_rows(x, rows):
        return x if x.shape[0] == rows else jnp.pad(
            x, ((0, rows - x.shape[0]), (0, 0)))

    obj2d_p = pad_rows(obj2d, BN_pad).astype(compute_dtype)  # MXU-only operand
    attr2d_p = pad_rows(attr2d, BN_pad)
    rela2d_p = pad_rows(rela2d, BE_pad)
    s_idx_p = pad_rows(s_idx, BE_pad)
    o_idx_p = pad_rows(o_idx, BE_pad)
    mask2d_p = pad_rows(mask2d, BE_pad)

    # ---- weights: (in, out) layout; MXU operands pre-cast, biases f32 -----
    w_att = params["w_att"].T.astype(compute_dtype)       # (2d, d)
    w1 = params["w1"].T.astype(compute_dtype)             # (2d, d)
    w2 = params["w2"].T.astype(compute_dtype)             # (3d, d)
    b_att = params["b_att"].reshape(1, d).astype(jnp.float32)
    b1 = params["b1"].reshape(1, d).astype(jnp.float32)
    b2 = params["b2"].reshape(1, d).astype(jnp.float32)

    def tiled_bn(cols):
        return pl.BlockSpec((tile_bn, cols), lambda i: (i, 0))

    def tiled_be(cols):
        return pl.BlockSpec((tile_be, cols), lambda i: (i, 0))

    def full_spec(shape):
        return pl.BlockSpec(shape, lambda i: tuple(0 for _ in shape))

    flops = (2 * BN_pad * (2 * d) * d              # att_vecs linear
             + 2 * BN_pad * (2 * d) * d            # gnn_attr linear
             + 2 * (2 * BE_pad) * BN_pad * d       # stacked one-hot gather
             + 2 * BE_pad * (3 * d) * d)           # gnn_rela linear
    in_arrays = (obj2d_p, attr2d_p, rela2d_p, s_idx_p, o_idx_p, mask2d_p,
                 w_att, b_att, w1, b1, w2, b2)
    bytes_accessed = (sum(int(a.size) * a.dtype.itemsize for a in in_arrays)
                      + (BN_pad + BE_pad) * d * 4)

    # TODO(synk): with d=32 the outputs are lane-sparse (32 < 128 lanes);
    # a (rows/4, 128) lane-dense relayout is only worth it if store-bound.
    new_attr2d, new_rela2d = pl.pallas_call(
        _gnn_kernel,
        grid=(G,),
        out_shape=(
            jax.ShapeDtypeStruct((BN_pad, d), jnp.float32),
            jax.ShapeDtypeStruct((BE_pad, d), jnp.float32),
        ),
        in_specs=[
            full_spec((BN_pad, d)),            # obj (resident across grid steps)
            tiled_bn(2 * d),                   # attr_in
            tiled_be(d),                       # rela
            tiled_be(2 - 1),                   # s_idx  (tile_be, 1)
            tiled_be(1),                       # o_idx
            tiled_be(1),                       # mask
            full_spec((2 * d, d)), full_spec((1, d)),   # w_att, b_att
            full_spec((2 * d, d)), full_spec((1, d)),   # w1, b1
            full_spec((3 * d, d)), full_spec((1, d)),   # w2, b2
        ],
        out_specs=(tiled_bn(d), tiled_be(d)),
        compiler_params=pltpu.CompilerParams(
            dimension_semantics=("parallel",),          # megacore row split (v7x)
            vmem_limit_bytes=48 * 1024 * 1024),         # fits v7x's 64 MiB VMEM
        cost_estimate=pl.CostEstimate(flops=flops, transcendentals=0,
                                      bytes_accessed=bytes_accessed),
    )(obj2d_p, attr2d_p, rela2d_p, s_idx_p, o_idx_p, mask2d_p,
      w_att, b_att, w1, b1, w2, b2)

    # ---- feat_2d_to_3d glue -----------------------------------------------
    new_obj_vecs = obj_vecs
    new_attr_vecs = new_attr2d[:BN].reshape(B, No, d)
    new_rela_vecs = new_rela2d[:BE].reshape(B, Nr, d)
    return new_obj_vecs, new_attr_vecs, new_rela_vecs


def gnn_reference(params, obj_vecs, attr_vecs, rela_vecs, edges, rela_masks):
    """Pure-JAX reference (mirrors the PyTorch forward, eval mode)."""
    B, No, d = obj_vecs.shape
    Nr = rela_vecs.shape[1]
    attr_lin = jnp.einsum("bnf,of->bno", attr_vecs, params["w_att"]) + params["b_att"]
    obj2d = obj_vecs.reshape(-1, d)
    attr2d = attr_lin.reshape(-1, d)
    rela2d = rela_vecs.reshape(-1, d)
    offsets = (jnp.arange(B, dtype=edges.dtype) * No)[:, None, None]
    e2d = (edges + offsets).reshape(-1, 2)
    new_attr = jax.nn.relu(
        jnp.concatenate([obj2d, attr2d], -1) @ params["w1"].T + params["b1"]
    ) + attr2d
    s_vecs = obj2d[e2d[:, 0]]
    o_vecs = obj2d[e2d[:, 1]]
    t = jnp.concatenate([s_vecs, rela2d, o_vecs], -1)
    new_rela = jax.nn.relu(t @ params["w2"].T + params["b2"]) + rela2d
    new_rela = new_rela.reshape(B, Nr, d) * rela_masks
    return obj_vecs, new_attr.reshape(B, No, d), new_rela


if __name__ == "__main__":
    key = jax.random.PRNGKey(0)
    B, No, Nr, d = 2, 8, 8, 32   # rnn_size = 32

    kp, k0, k1, k2, k3, k4 = jax.random.split(key, 6)
    params = init_params(kp, d)

    obj_vecs = jax.random.normal(k0, (B, No, d), jnp.float32)
    attr_vecs = jax.random.normal(k1, (B, No, 2 * d), jnp.float32)
    rela_vecs = jax.random.normal(k2, (B, Nr, d), jnp.float32)
    edges = jax.random.randint(k3, (B, Nr, 2), 0, No, jnp.int32)
    rela_masks = (jax.random.uniform(k4, (B, Nr, 1)) > 0.2).astype(jnp.float32)

    refs = gnn_reference(params, obj_vecs, attr_vecs, rela_vecs, edges, rela_masks)

    # f32 MXU operands, single row tile (G = 1)
    outs = jax.block_until_ready(
        gnn_forward(params, obj_vecs, attr_vecs, rela_vecs, edges, rela_masks))
    for o, r in zip(outs, refs):
        assert o.shape == r.shape and o.dtype == r.dtype
        assert jnp.allclose(o, r, atol=1e-4, rtol=1e-4), "f32 mismatch vs reference"

    # f32, forced multi-tile grid (exercises the row-tiled / pipelined path)
    outs_tiled = jax.block_until_ready(
        gnn_forward(params, obj_vecs, attr_vecs, rela_vecs, edges, rela_masks,
                    row_tile=8))
    for o, r in zip(outs_tiled, refs):
        assert jnp.allclose(o, r, atol=1e-4, rtol=1e-4), "tiled f32 mismatch"

    # bf16 MXU operands (f32 accumulation + f32 epilogue) — looser tolerance
    outs_bf16 = jax.block_until_ready(
        gnn_forward(params, obj_vecs, attr_vecs, rela_vecs, edges, rela_masks,
                    compute_dtype=jnp.bfloat16, row_tile=8))
    for o, r in zip(outs_bf16, refs):
        assert jnp.allclose(o, r, atol=5e-2, rtol=5e-2), "bf16 mismatch vs reference"

    print("KERNEL_OK")
</pallas_src>

<mosaic_0001>
module attributes {stable_mosaic.version = 11 : i64} {
  func.func @_gnn_kernel(%arg0: i32, %arg1: memref<16x32xf32, #tpu.memory_space<vmem>>, %arg2: memref<16x64xf32, #tpu.memory_space<vmem>>, %arg3: memref<16x32xf32, #tpu.memory_space<vmem>>, %arg4: memref<16x1xi32, #tpu.memory_space<vmem>>, %arg5: memref<16x1xi32, #tpu.memory_space<vmem>>, %arg6: memref<16x1xf32, #tpu.memory_space<vmem>>, %arg7: memref<64x32xf32, #tpu.memory_space<vmem>>, %arg8: memref<1x32xf32, #tpu.memory_space<vmem>>, %arg9: memref<64x32xf32, #tpu.memory_space<vmem>>, %arg10: memref<1x32xf32, #tpu.memory_space<vmem>>, %arg11: memref<96x32xf32, #tpu.memory_space<vmem>>, %arg12: memref<1x32xf32, #tpu.memory_space<vmem>>, %arg13: memref<16x32xf32, #tpu.memory_space<vmem>>, %arg14: memref<16x32xf32, #tpu.memory_space<vmem>>) attributes {dimension_semantics = [#tpu.dimension_semantics<parallel>], iteration_bounds = array<i64: 1>, scalar_prefetch = 0 : i64, scratch_operands = 0 : i64, tpu.core_type = #tpu.core_type<tc>, window_params = [{pipeline_mode = #tpu.pipeline_mode<synchronous>, transform_indices = @transform_0, window_bounds = array<i64: 16, 32>}, {transform_indices = @transform_1, window_bounds = array<i64: 16, 64>}, {transform_indices = @transform_2, window_bounds = array<i64: 16, 32>}, {transform_indices = @transform_3, window_bounds = array<i64: 16, 1>}, {transform_indices = @transform_4, window_bounds = array<i64: 16, 1>}, {transform_indices = @transform_5, window_bounds = array<i64: 16, 1>}, {pipeline_mode = #tpu.pipeline_mode<synchronous>, transform_indices = @transform_6, window_bounds = array<i64: 64, 32>}, {pipeline_mode = #tpu.pipeline_mode<synchronous>, transform_indices = @transform_7, window_bounds = array<i64: 1, 32>}, {pipeline_mode = #tpu.pipeline_mode<synchronous>, transform_indices = @transform_8, window_bounds = array<i64: 64, 32>}, {pipeline_mode = #tpu.pipeline_mode<synchronous>, transform_indices = @transform_9, window_bounds = array<i64: 1, 32>}, {pipeline_mode = #tpu.pipeline_mode<synchronous>, transform_indices = @transform_10, window_bounds = array<i64: 96, 32>}, {pipeline_mode = #tpu.pipeline_mode<synchronous>, transform_indices = @transform_11, window_bounds = array<i64: 1, 32>}, {transform_indices = @transform_12, window_bounds = array<i64: 16, 32>}, {transform_indices = @transform_13, window_bounds = array<i64: 16, 32>}]} {
    %c16_i32 = arith.constant 16 : i32
    %0 = arith.muli %arg0, %c16_i32 : i32
    %1 = tpu.assume_multiple %0, 16 : i32
    %2 = arith.index_cast %1 : i32 to index
    %c0 = arith.constant 0 : index
    %3 = vector.load %arg1[%2, %c0] : memref<16x32xf32, #tpu.memory_space<vmem>>, vector<16x32xf32>
    %c0_0 = arith.constant 0 : index
    %c0_1 = arith.constant 0 : index
    %4 = vector.load %arg2[%c0_0, %c0_1] : memref<16x64xf32, #tpu.memory_space<vmem>>, vector<16x64xf32>
    %c0_2 = arith.constant 0 : index
    %c0_3 = arith.constant 0 : index
    %5 = vector.load %arg3[%c0_2, %c0_3] : memref<16x32xf32, #tpu.memory_space<vmem>>, vector<16x32xf32>
    %c0_4 = arith.constant 0 : index
    %c0_5 = arith.constant 0 : index
    %6 = vector.load %arg6[%c0_4, %c0_5] : memref<16x1xf32, #tpu.memory_space<vmem>>, vector<16x1xf32>
    %c0_6 = arith.constant 0 : index
    %c0_7 = arith.constant 0 : index
    %7 = vector.load %arg7[%c0_6, %c0_7] : memref<64x32xf32, #tpu.memory_space<vmem>>, vector<64x32xf32>
    %cst = arith.constant dense<0.000000e+00> : vector<16x32xf32>
    %8 = tpu.matmul %4, %7, %cst {dimension_numbers = #tpu.dot_dimension_numbers<[1], [0], [0], [1], [0, 0, 1, 1], [], []>} : vector<16x64xf32>, vector<64x32xf32>, vector<16x32xf32> -> vector<16x32xf32>
    %c0_8 = arith.constant 0 : index
    %c0_9 = arith.constant 0 : index
    %9 = vector.load %arg8[%c0_8, %c0_9] : memref<1x32xf32, #tpu.memory_space<vmem>>, vector<1x32xf32>
    %10 = vector.broadcast %9 : vector<1x32xf32> to vector<16x32xf32>
    %11 = arith.addf %8, %10 : vector<16x32xf32>
    %12 = tpu.concatenate %3, %11 in 1 : vector<16x32xf32>, vector<16x32xf32> -> vector<16x64xf32>
    %c0_10 = arith.constant 0 : index
    %c0_11 = arith.constant 0 : index
    %13 = vector.load %arg9[%c0_10, %c0_11] : memref<64x32xf32, #tpu.memory_space<vmem>>, vector<64x32xf32>
    %cst_12 = arith.constant dense<0.000000e+00> : vector<16x32xf32>
    %14 = tpu.matmul %12, %13, %cst_12 {dimension_numbers = #tpu.dot_dimension_numbers<[1], [0], [0], [1], [0, 0, 1, 1], [], []>} : vector<16x64xf32>, vector<64x32xf32>, vector<16x32xf32> -> vector<16x32xf32>
    %c0_13 = arith.constant 0 : index
    %c0_14 = arith.constant 0 : index
    %15 = vector.load %arg10[%c0_13, %c0_14] : memref<1x32xf32, #tpu.memory_space<vmem>>, vector<1x32xf32>
    %16 = vector.broadcast %15 : vector<1x32xf32> to vector<16x32xf32>
    %17 = arith.addf %14, %16 : vector<16x32xf32>
    %cst_15 = arith.constant 0.000000e+00 : f32
    %18 = vector.broadcast %cst_15 : f32 to vector<16x32xf32>
    %19 = arith.maximumf %17, %18 : vector<16x32xf32>
    %20 = arith.addf %19, %11 : vector<16x32xf32>
    %c0_16 = arith.constant 0 : index
    %c0_17 = arith.constant 0 : index
    %21 = vector.load %arg13[%c0_16, %c0_17] : memref<16x32xf32, #tpu.memory_space<vmem>>, vector<16x32xf32>
    tpu.vector_store %arg13[%c0_16, %c0_17], %20 {strides = array<i32>} : memref<16x32xf32, #tpu.memory_space<vmem>>, vector<16x32xf32>,
    %c0_18 = arith.constant 0 : index
    %c0_19 = arith.constant 0 : index
    %22 = vector.load %arg4[%c0_18, %c0_19] : memref<16x1xi32, #tpu.memory_space<vmem>>, vector<16x1xi32>
    %c0_20 = arith.constant 0 : index
    %c0_21 = arith.constant 0 : index
    %23 = vector.load %arg5[%c0_20, %c0_21] : memref<16x1xi32, #tpu.memory_space<vmem>>, vector<16x1xi32>
    %24 = tpu.concatenate %22, %23 in 0 : vector<16x1xi32>, vector<16x1xi32> -> vector<32x1xi32>
    %25 = tpu.iota {dimensions = array<i32: 1>} : vector<32x16xi32>
    %26 = vector.broadcast %24 : vector<32x1xi32> to vector<32x16xi32>
    %27 = arith.cmpi eq, %25, %26 : vector<32x16xi32>
    %28 = arith.extui %27 : vector<32x16xi1> to vector<32x16xi32>
    %29 = arith.sitofp %28 : vector<32x16xi32> to vector<32x16xf32>
    %c0_22 = arith.constant 0 : index
    %c0_23 = arith.constant 0 : index
    %30 = vector.load %arg1[%c0_22, %c0_23] : memref<16x32xf32, #tpu.memory_space<vmem>>, vector<16x32xf32>
    %cst_24 = arith.constant dense<0.000000e+00> : vector<32x32xf32>
    %31 = tpu.matmul %29, %30, %cst_24 {dimension_numbers = #tpu.dot_dimension_numbers<[1], [0], [0], [1], [0, 0, 1, 1], [], []>} : vector<32x16xf32>, vector<16x32xf32>, vector<32x32xf32> -> vector<32x32xf32>
    %32 = vector.extract_strided_slice %31 {offsets = [0, 0], sizes = [16, 32], strides = [1, 1]} : vector<32x32xf32> to vector<16x32xf32>
    %33 = vector.extract_strided_slice %31 {offsets = [16, 0], sizes = [16, 32], strides = [1, 1]} : vector<32x32xf32> to vector<16x32xf32>
    %34 = tpu.concatenate %32, %5, %33 in 1 : vector<16x32xf32>, vector<16x32xf32>, vector<16x32xf32> -> vector<16x96xf32>
    %c0_25 = arith.constant 0 : index
    %c0_26 = arith.constant 0 : index
    %35 = vector.load %arg11[%c0_25, %c0_26] : memref<96x32xf32, #tpu.memory_space<vmem>>, vector<96x32xf32>
    %cst_27 = arith.constant dense<0.000000e+00> : vector<16x32xf32>
    %36 = tpu.matmul %34, %35, %cst_27 {dimension_numbers = #tpu.dot_dimension_numbers<[1], [0], [0], [1], [0, 0, 1, 1], [], []>} : vector<16x96xf32>, vector<96x32xf32>, vector<16x32xf32> -> vector<16x32xf32>
    %c0_28 = arith.constant 0 : index
    %c0_29 = arith.constant 0 : index
    %37 = vector.load %arg12[%c0_28, %c0_29] : memref<1x32xf32, #tpu.memory_space<vmem>>, vector<1x32xf32>
    %38 = vector.broadcast %37 : vector<1x32xf32> to vector<16x32xf32>
    %39 = arith.addf %36, %38 : vector<16x32xf32>
    %cst_30 = arith.constant 0.000000e+00 : f32
    %40 = vector.broadcast %cst_30 : f32 to vector<16x32xf32>
    %41 = arith.maximumf %39, %40 : vector<16x32xf32>
    %42 = arith.addf %41, %5 : vector<16x32xf32>
    %43 = vector.broadcast %6 : vector<16x1xf32> to vector<16x32xf32>
    %44 = arith.mulf %42, %43 : vector<16x32xf32>
    %c0_31 = arith.constant 0 : index
    %c0_32 = arith.constant 0 : index
    %45 = vector.load %arg14[%c0_31, %c0_32] : memref<16x32xf32, #tpu.memory_space<vmem>>, vector<16x32xf32>
    tpu.vector_store %arg14[%c0_31, %c0_32], %44 {strides = array<i32>} : memref<16x32xf32, #tpu.memory_space<vmem>>, vector<16x32xf32>,
    return
  }
  func.func @transform_0(%arg0: i32) -> (i32, i32) {
    %c0_i32 = arith.constant 0 : i32
    %c0_i32_0 = arith.constant 0 : i32
    %c0_i32_1 = arith.constant 0 : i32
    return %c0_i32, %c0_i32_0 : i32, i32
  }
  func.func @transform_1(%arg0: i32) -> (i32, i32) {
    %c0_i32 = arith.constant 0 : i32
    %c0_i32_0 = arith.constant 0 : i32
    return %arg0, %c0_i32 : i32, i32
  }
  func.func @transform_2(%arg0: i32) -> (i32, i32) {
    %c0_i32 = arith.constant 0 : i32
    %c0_i32_0 = arith.constant 0 : i32
    return %arg0, %c0_i32 : i32, i32
  }
  func.func @transform_3(%arg0: i32) -> (i32, i32) {
    %c0_i32 = arith.constant 0 : i32
    %c0_i32_0 = arith.constant 0 : i32
    return %arg0, %c0_i32 : i32, i32
  }
  func.func @transform_4(%arg0: i32) -> (i32, i32) {
    %c0_i32 = arith.constant 0 : i32
    %c0_i32_0 = arith.constant 0 : i32
    return %arg0, %c0_i32 : i32, i32
  }
  func.func @transform_5(%arg0: i32) -> (i32, i32) {
    %c0_i32 = arith.constant 0 : i32
    %c0_i32_0 = arith.constant 0 : i32
    return %arg0, %c0_i32 : i32, i32
  }
  func.func @transform_6(%arg0: i32) -> (i32, i32) {
    %c0_i32 = arith.constant 0 : i32
    %c0_i32_0 = arith.constant 0 : i32
    %c0_i32_1 = arith.constant 0 : i32
    return %c0_i32, %c0_i32_0 : i32, i32
  }
  func.func @transform_7(%arg0: i32) -> (i32, i32) {
    %c0_i32 = arith.constant 0 : i32
    %c0_i32_0 = arith.constant 0 : i32
    %c0_i32_1 = arith.constant 0 : i32
    return %c0_i32, %c0_i32_0 : i32, i32
  }
  func.func @transform_8(%arg0: i32) -> (i32, i32) {
    %c0_i32 = arith.constant 0 : i32
    %c0_i32_0 = arith.constant 0 : i32
    %c0_i32_1 = arith.constant 0 : i32
    return %c0_i32, %c0_i32_0 : i32, i32
  }
  func.func @transform_9(%arg0: i32) -> (i32, i32) {
    %c0_i32 = arith.constant 0 : i32
    %c0_i32_0 = arith.constant 0 : i32
    %c0_i32_1 = arith.constant 0 : i32
    return %c0_i32, %c0_i32_0 : i32, i32
  }
  func.func @transform_10(%arg0: i32) -> (i32, i32) {
    %c0_i32 = arith.constant 0 : i32
    %c0_i32_0 = arith.constant 0 : i32
    %c0_i32_1 = arith.constant 0 : i32
    return %c0_i32, %c0_i32_0 : i32, i32
  }
  func.func @transform_11(%arg0: i32) -> (i32, i32) {
    %c0_i32 = arith.constant 0 : i32
    %c0_i32_0 = arith.constant 0 : i32
    %c0_i32_1 = arith.constant 0 : i32
    return %c0_i32, %c0_i32_0 : i32, i32
  }
  func.func @transform_12(%arg0: i32) -> (i32, i32) {
    %c0_i32 = arith.constant 0 : i32
    %c0_i32_0 = arith.constant 0 : i32
    return %arg0, %c0_i32 : i32, i32
  }
  func.func @transform_13(%arg0: i32) -> (i32, i32) {
    %c0_i32 = arith.constant 0 : i32
    %c0_i32_0 = arith.constant 0 : i32
    return %arg0, %c0_i32 : i32, i32
  }
}

</mosaic_0001>

<bundles_post_ra>
// kernel: gnn_forward.1
= control target key start
LH: loop header
LB: loop body
LE: loop exit
PB: predicated region body
PF: predicated region fallthrough
CT: control target
= control target key end

     0   :  { %19 = vsyncpa [#allocation3], 0  ;;  %v752_v3 = vmov 0   ;;  %vm70_vm0 = vcmask 523264   ;;  %s1011_s0 = inlined_call_operand.vmem [shape: f32[16,32], index: 0, kind: input, shape index: {}]   ;;  %s1012_s1 = inlined_call_operand.vmem [shape: f32[16,64], index: 1, kind: input, shape index: {}]   ;;  %s1013_s2 = inlined_call_operand.vmem [shape: f32[16,32], index: 2, kind: input, shape index: {}]   ;;  %s1014_s3 = inlined_call_operand.vmem [shape: s32[16,1], index: 3, kind: input, shape index: {}]   ;;  %s1015_s4 = inlined_call_operand.vmem [shape: s32[16,1], index: 4, kind: input, shape index: {}]   ;;  %s1016_s5 = inlined_call_operand.vmem [shape: f32[16,1], index: 5, kind: input, shape index: {}]   ;;  %s1017_s6 = inlined_call_operand.vmem [shape: f32[64,32], index: 6, kind: input, shape index: {}]   ;;  %s1018_s7 = inlined_call_operand.vmem [shape: f32[1,32], index: 7, kind: input, shape index: {}]   ;;  %s1019_s8 = inlined_call_operand.vmem [shape: f32[64,32], index: 8, kind: input, shape index: {}]   ;;  %s1020_s9 = inlined_call_operand.vmem [shape: f32[1,32], index: 9, kind: input, shape index: {}]   ;;  %s1021_s10 = inlined_call_operand.vmem [shape: f32[96,32], index: 10, kind: input, shape index: {}]   ;;  %s1022_s11 = inlined_call_operand.vmem [shape: f32[1,32], index: 11, kind: input, shape index: {}]   ;;  %s1023_s12 = inlined_call_operand.hbm [shape: f32[16,32], index: 12, kind: output, shape index: {0}]   ;;  %s1024_s13 = inlined_call_operand.hbm [shape: f32[16,32], index: 13, kind: output, shape index: {1}]  }
   0x1   :  { %v62_v0 = vld [vmem:[%s1017_s6 + $0x38] sm:$0xff]  ;;  %v267_v1 = vld [vmem:[%s1015_s4] sm:$0xff]  ;;  %707 = vset.pattern.permute.xlu1 %v752_v3  ;;  %706 = vset.pattern.permute.xlu0 %v752_v3  ;;  %v61_v4 = vld [vmem:[%s1017_s6 + $0x30] sm:$0xff] }
   0x2   :  { %v265_v2 = vld [vmem:[%s1014_s3] sm:$0xff]  ;;  %623 = vmatprep.subr.mxu0 %v62_v0  ;;  %278 = vperm.xlu1 %707, %v267_v1   ;;  %v60_v5 = vld [vmem:[%s1017_s6 + $0x28] sm:$0xff] }
   0x3   :  { %272 = vperm.xlu0 %706, %v265_v2   ;;  %624 = vmatpush3.msra.mxu0 %v62_v0  ;;  %v268_v6 = vld [vmem:[%s1015_s4 + $0x8] sm:$0xff]  ;;  %v49_v8 = vld [vmem:[%s1012_s1] sm:$0xff] }
   0x4   :  { %625 = vmatprep.subr.mxu0 %v61_v4  ;;  %v266_v7 = vld [vmem:[%s1014_s3 + $0x8] sm:$0xff]  ;;  %v59_v9 = vld [vmem:[%s1017_s6 + $0x20] sm:$0xff]  ;;  %639 = vmatprep.mubr.msk.f32.mxu0 %vm70_vm0, %v49_v8 }
   0x5   :  { %626 = vmatpush3.msra.mxu0 %v61_v4 }
   0x6   :  { %20 = vsyncpa [#allocation5], 0  ;;  %627 = vmatprep.subr.mxu0 %v60_v5  ;;  %281 = vperm.xlu1 %707, %v268_v6   ;;  %v58_v10 = vld [vmem:[%s1017_s6 + $0x18] sm:$0xff]  ;;  %v57_v11 = vld [vmem:[%s1017_s6 + $0x10] sm:$0xff]  ;;  %v269_v22 = vlaneseq  ;;  %vm297_vm1 = vcmask 130048   ;;  %v753_v26 = vmov 0.0  }
   0x7   :  { %275 = vperm.xlu0 %706, %v266_v7   ;;  %628 = vmatpush3.msra.mxu0 %v60_v5  ;;  %v56_v12 = vld [vmem:[%s1017_s6 + $0x8] sm:$0xff]  ;;  %v55_v13 = vld [vmem:[%s1017_s6] sm:$0xff]  ;;  %v170_v17 = vld [vmem:[%s1019_s8 + $0x38] sm:$0xff]  ;;  %s754_s19 = smov 32   ;;  %vm160_vm6 = vcmask 261120   ;;  %s755_s6 = smov 64  }
   0x8   :  { %629 = vmatprep.subr.mxu0 %v59_v9  ;;  %v50_v14 = vld [vmem:[%s1012_s1 + $0x8] sm:$0xff]  ;;  %v881_v16 = vld [vmem:[%s1011_s0] sm:$0xff]  ;;  %v169_v18 = vld [vmem:[%s1019_s8 + $0x30] sm:$0xff]  ;;  %642 = vmatprep.subr.mxu1 %v170_v17  ;;  %v270_v23 = vand.u32 127, %v269_v22  ;;  %vm434_vm7 = vcmask 785408   ;;  %s756_s21 = smov [#allocation2]  }
   0x9   :  { %630 = vmatpush3.msra.mxu0 %v59_v9  ;;  %v876_v15 = vld [vmem:[%s1011_s0 + $0x8] sm:$0xff]  ;;  %643 = vmatpush3.msra.mxu1 %v170_v17  ;;  %v167_v20 = vld [vmem:[%s1019_s8 + $0x20] sm:$0xff]  ;;  %v166_v21 = vld [vmem:[%s1019_s8 + $0x18] sm:$0xff]  ;;  %s539_s22 = sshll.u32 %s756_s21, 4  ;;  %s540_s22 = int_to_ptr.vmem [resolvable:$true] %s539_s22 }
   0xa   :  { %631 = vmatprep.subr.mxu0 %v58_v10  ;;  %v168_v19 = vld [vmem:[%s1019_s8 + $0x28] sm:$0xff]  ;;  %644 = vmatprep.subr.mxu1 %v169_v18  ;;  %v165_v33 = vld [vmem:[%s1019_s8 + $0x10] sm:$0xff]  ;;  %v163_v35 = vld [vmem:[%s1019_s8] sm:$0xff]  ;;  %s708_s0 = scalar_lea.vmem %s540_s22, 256  ;;  %p713_p1 = scmp.lt.s32.totalorder %s540_s22, %s540_s22 }
   0xb   :  { %632 = vmatpush3.msra.mxu0 %v58_v10  ;;  %645 = vmatpush3.msra.mxu1 %v169_v18  ;;  %v164_v34 = vld [vmem:[%s1019_s8 + $0x8] sm:$0xff]  ;;  %v566_v36 = vld [vmem:[%s1018_s7] ss:$0 sm:$0xff]  ;;  %v426_v37 = vld [vmem:[%s1021_s10 + $0x58] sm:$0xff]  ;;  %p709_p0 = scmp.ne.s32.totalorder %s540_s22, %s708_s0  ;;  %p714_p2 = scmp.lt.s32.totalorder %s708_s0, %s708_s0 }
   0xc   :  { %633 = vmatprep.subr.mxu0 %v57_v11  ;;  %646 = vmatprep.subr.mxu1 %v168_v19  ;;  %v926_v42 = vld [vmem:[%s1013_s2 + $0x8] sm:$0xff]  ;;  %v932_v43 = vld [vmem:[%s1013_s2] sm:$0xff]  ;;  %v425_v53 = vld [vmem:[%s1021_s10 + $0x50] sm:$0xff] }
   0xd   :  { %634 = vmatpush3.msra.mxu0 %v57_v11  ;;  %647 = vmatpush3.msra.mxu1 %v168_v19  ;;  %v54_v52 = vld [vmem:[%s1016_s5 + $0x8] sm:$0xff]  ;;  %v53_v54 = vld [vmem:[%s1016_s5] sm:$0xff]  ;;  %v422_v57 = vld [vmem:[%s1021_s10 + $0x38] sm:$0xff]  ;;  %p715_p3 = por %p714_p2, %p713_p1 }
   0xe   :  { %635 = vmatprep.subr.mxu0 %v56_v12  ;;  %648 = vmatprep.subr.mxu1 %v167_v20  ;;  %v424_v55 = vld [vmem:[%s1021_s10 + $0x48] sm:$0xff]  ;;  %v423_v56 = vld [vmem:[%s1021_s10 + $0x40] sm:$0xff]  ;;  %v421_v58 = vld [vmem:[%s1021_s10 + $0x30] sm:$0xff] }
   0xf   :  { %636 = vmatpush3.msra.mxu0 %v56_v12  ;;  %649 = vmatpush3.msra.mxu1 %v167_v20  ;;  %v420_v59 = vld [vmem:[%s1021_s10 + $0x28] sm:$0xff]  ;;  %v419_v60 = vld [vmem:[%s1021_s10 + $0x20] sm:$0xff]  ;;  %v418_v61 = vld [vmem:[%s1021_s10 + $0x18] sm:$0xff]  ;;  %p716_p4 = pnand %p715_p3, %p709_p0 }
  0x10   :  { %637 = vmatprep.subr.mxu0 %v55_v13  ;;  %650 = vmatprep.subr.mxu1 %v166_v21  ;;  %v417_v62 = vld [vmem:[%s1021_s10 + $0x10] sm:$0xff]  ;;  %v416_v63 = vld [vmem:[%s1021_s10 + $0x8] sm:$0xff]  ;;  %v415_v0 = vld [vmem:[%s1021_s10] sm:$0xff] }
  0x11   :  { %638 = vmatpush3.msra.mxu0 %v55_v13  ;;  %651 = vmatpush3.msra.mxu1 %v166_v21  ;;  %v569_v9 = vld [vmem:[%s1020_s9] ss:$0 sm:$0xff] }
  0x12   :  { %640 = vmatmul.mubr.msk.f32.vlgmr.msra.gmra.mxu0 %vm70_vm0, %v50_v14  ;;  %661 = vmatprep.subr.mxu0 %v876_v15 }
  0x13   :  { %662 = vmatpush3.msra.mxu0 %v876_v15  ;;  %652 = vmatprep.subr.mxu1 %v165_v33 }
  0x14   :  { %663 = vmatprep.subr.mxu0 %v881_v16  ;;  %653 = vmatpush3.msra.mxu1 %v165_v33 }
  0x15   :  { %664 = vmatpush3.msra.mxu0 %v881_v16  ;;  %654 = vmatprep.subr.mxu1 %v164_v34 }
  0x16   :  { %655 = vmatpush3.msra.mxu1 %v164_v34 }
  0x17   :  { %656 = vmatprep.subr.mxu1 %v163_v35 }
  0x18   :  { %657 = vmatpush3.msra.mxu1 %v163_v35 }
  0x19   :  { %671 = vmatprep.subr.mxu1 %v426_v37 }
  0x7d   :  { %v279_v24 = vpop.permute.xlu1 %278 }
  0x7e   :  { %v273_v25 = vpop.permute.xlu0 %272  ;;  %vm285_vm3 = vcmp.eq.s32.totalorder %v270_v23, %v279_v24 }
  0x7f   :  { %vm283_vm2 = vcmp.eq.s32.totalorder %v270_v23, %v273_v25  ;;  %v574_v30 = vsel %vm285_vm3, 1.0, %v753_v26 }
  0x80   :  { %v572_v27 = vsel %vm283_vm2, 1.0, %v753_v26 }
  0x81   :  { %665 = vmatprep.mubr.msk.f32.mxu0 %vm297_vm1, %v572_v27  ;;  %v282_v28 = vpop.permute.xlu1 %281 }
  0x82   :  { %v276_v29 = vpop.permute.xlu0 %275  ;;  %vm286_vm5 = vcmp.eq.s32.totalorder %v270_v23, %v282_v28 }
  0x83   :  { %vm284_vm4 = vcmp.eq.s32.totalorder %v270_v23, %v276_v29  ;;  %v575_v32 = vsel %vm286_vm5, 1.0, %v753_v26 }
  0x84   :  { %v573_v31 = vsel %vm284_vm4, 1.0, %v753_v26 }
  0x85   :  { %666 = vmatmul.mubr.msk.f32.vlgmr.msra.gmra.mxu0 %vm297_vm1, %v573_v31 }
  0x86   :  { %668 = vmatprep.mubr.msk.f32.mxu0 %vm297_vm1, %v574_v30 }
  0x89   :  { %669 = vmatmul.mubr.msk.f32.gmra.mxu0 %vm297_vm1, %v575_v32 }
  0xd2   :  { %v641_v38 = vpop.f32.mrf.mxu0 }
  0xd3   :  { %v918_v39 = vadd.f32 %v641_v38, %v566_v36 }
  0xd4   :  { %v143_v40 = vpop.f32.mrf.mxu0 }
  0xd5   :  { %v920_v41 = vadd.f32 %v566_v36, %v143_v40  ;;  %156 = vrot.lane.b32.xlu1 %v918_v39, %s754_s19 }
  0xd7   :  { %154 = vrot.lane.b32.xlu0 %v920_v41, %s754_s19 }
  0xd9   :  { %399 = vrot.lane.b32.xlu1 %v926_v42, %s754_s19 }
  0xdb   :  { %397 = vrot.lane.b32.xlu0 %v932_v43, %s754_s19 }
 0x145   :  { %v667_v44 = vpop.f32.mrf.mxu0 }
 0x147   :  { %v376_v45 = vpop.f32.mrf.mxu0  ;;  %v157_v46 = vpop.permute.xlu1 %156 }
 0x148   :  { %v162_v47 = vsel %vm160_vm6, %v876_v15, %v157_v46 }
 0x149   :  { %v670_v48 = vpop.f32.mrf.mxu0  ;;  %v155_v49 = vpop.permute.xlu0 %154 }
 0x14a   :  { %407 = vrot.lane.b32.xlu1 %v670_v48, %s755_s6  ;;  %v161_v50 = vsel %vm160_vm6, %v881_v16, %v155_v49 }
 0x14b   :  { %658 = vmatprep.mubr.msk.f32.mxu1 %vm70_vm0, %v161_v50  ;;  %v386_v51 = vpop.f32.mrf.mxu0  ;;  %v400_v1 = vpop.permute.xlu1 %399 }
 0x14c   :  { %405 = vrot.lane.b32.xlu0 %v386_v51, %s755_s6  ;;  %659 = vmatmul.mubr.msk.f32.vlgmr.msra.gmra.mxu1 %vm70_vm0, %v162_v47  ;;  %v412_v6 = vsel %vm160_vm6, %v667_v44, %v400_v1 }
 0x14d   :  { %672 = vmatpush3.msra.mxu1 %v426_v37  ;;  %v398_v2 = vpop.permute.xlu0 %397 }
 0x14e   :  { %527 = vperm.xlu1 %707, %v54_v52   ;;  %673 = vmatprep.subr.mxu1 %v425_v53  ;;  %v411_v4 = vsel %vm160_vm6, %v376_v45, %v398_v2 }
 0x14f   :  { %674 = vmatpush3.msra.mxu1 %v425_v53 }
 0x150   :  { %522 = vperm.xlu0 %706, %v53_v54   ;;  %675 = vmatprep.subr.mxu1 %v424_v55 }
 0x151   :  { %676 = vmatpush3.msra.mxu1 %v424_v55 }
 0x152   :  { %677 = vmatprep.subr.mxu1 %v423_v56 }
 0x153   :  { %678 = vmatpush3.msra.mxu1 %v423_v56 }
 0x154   :  { %679 = vmatprep.subr.mxu1 %v422_v57 }
 0x155   :  { %680 = vmatpush3.msra.mxu1 %v422_v57 }
 0x156   :  { %681 = vmatprep.subr.mxu1 %v421_v58 }
 0x157   :  { %682 = vmatpush3.msra.mxu1 %v421_v58 }
 0x158   :  { %683 = vmatprep.subr.mxu1 %v420_v59 }
 0x159   :  { %684 = vmatpush3.msra.mxu1 %v420_v59 }
 0x15a   :  { %685 = vmatprep.subr.mxu1 %v419_v60 }
 0x15b   :  { %686 = vmatpush3.msra.mxu1 %v419_v60 }
 0x15c   :  { %687 = vmatprep.subr.mxu1 %v418_v61 }
 0x15d   :  { %688 = vmatpush3.msra.mxu1 %v418_v61 }
 0x15e   :  { %689 = vmatprep.subr.mxu1 %v417_v62 }
 0x15f   :  { %690 = vmatpush3.msra.mxu1 %v417_v62 }
 0x160   :  { %691 = vmatprep.subr.mxu1 %v416_v63 }
 0x161   :  { %692 = vmatpush3.msra.mxu1 %v416_v63 }
 0x162   :  { %693 = vmatprep.subr.mxu1 %v415_v0 }
 0x163   :  { %694 = vmatpush3.msra.mxu1 %v415_v0 }
 0x1bc   :  { %v408_v3 = vpop.permute.xlu1 %407 }
 0x1bd   :  { %v414_v8 = vsel %vm70_vm0, %v412_v6, %v408_v3 }
 0x1be   :  { %v406_v5 = vpop.permute.xlu0 %405 }
 0x1bf   :  { %v413_v7 = vsel %vm70_vm0, %v411_v4, %v406_v5 }
 0x1c0   :  { %695 = vmatprep.mubr.msk.f32.mxu1 %vm434_vm7, %v413_v7 }
 0x1c1   :  { %696 = vmatmul.mubr.msk.f32.vlgmr.msra.gmra.mxu1 %vm434_vm7, %v414_v8 }
 0x20c   :  { %v660_v10 = vpop.f32.mrf.mxu1 }
 0x20d   :  { %v256_v11 = vadd.f32 %v660_v10, %v569_v9 }
 0x20e   :  { %v250_v12 = vpop.f32.mrf.mxu1 }
 0x20f   :  { %v260_v13 = vmax.f32 %v256_v11, 0.0  ;;  %v251_v14 = vadd.f32 %v569_v9, %v250_v12 }
 0x211   :  { %v262_v15 = vadd.f32 %v260_v13, %v918_v39  ;;  %v259_v16 = vmax.f32 %v251_v14, 0.0 }
 0x213   :  { %264 = vst.msk [vmem:[#allocation2 + $0x8] sm:$0xff] %vm160_vm6, %v262_v15  ;;  %v261_v17 = vadd.f32 %v259_v16, %v920_v41 }
 0x215   :  { %263 = vst.msk [vmem:[#allocation2] sm:$0xff] %vm160_vm6, %v261_v17 }
 0x216   :  { %719 = shalt.err (!%p716_p4)
}
 0x217   :  { %s757_s9 = smov 128   ;;  %s758_s23 = smov 8   ;;  %v580_v18 = vld [vmem:[%s1022_s11] ss:$0 sm:$0xff]  ;;  %v528_v26 = vpop.permute.xlu1 %527  ;;  %v523_v29 = vpop.permute.xlu0 %522 }
 0x218   :  { %545 = dma.vmem_to_hbm [thread:$0]  %s540_s22, 256, %s1023_s12, [#allocation3], %s757_s9, %s757_s9, %s758_s23  }
 0x219   :  { %s759_s3 = smov [#allocation4]  }
 0x21a   :  { %s551_s27 = sshll.u32 %s759_s3, 4  ;;  %s552_s27 = int_to_ptr.vmem [resolvable:$true] %s551_s27 }
 0x21b   :  { %s728_s11 = scalar_lea.vmem %s552_s27, 256  ;;  %p733_p6 = scmp.lt.s32.totalorder %s552_s27, %s552_s27 }
 0x21c   :  { %p729_p5 = scmp.ne.s32.totalorder %s552_s27, %s728_s11  ;;  %p734_p7 = scmp.lt.s32.totalorder %s728_s11, %s728_s11 }
 0x21e   :  { %p735_p8 = por %p734_p7, %p733_p6 }
 0x220   :  { %p736_p9 = pnand %p735_p8, %p729_p5 }
 0x281   :  { %v697_v19 = vpop.f32.mrf.mxu1 }
 0x282   :  { %v513_v20 = vadd.f32 %v697_v19, %v580_v18 }
 0x283   :  { %v507_v21 = vpop.f32.mrf.mxu1 }
 0x284   :  { %v517_v22 = vmax.f32 %v513_v20, 0.0  ;;  %v508_v23 = vadd.f32 %v580_v18, %v507_v21 }
 0x286   :  { %v519_v24 = vadd.f32 %v517_v22, %v926_v42  ;;  %v516_v25 = vmax.f32 %v508_v23, 0.0 }
 0x288   :  { %v531_v27 = vmul.f32 %v528_v26, %v519_v24  ;;  %v518_v28 = vadd.f32 %v516_v25, %v932_v43 }
 0x28a   :  { %533 = vst.msk [vmem:[#allocation4 + $0x8] sm:$0xff] %vm160_vm6, %v531_v27  ;;  %v530_v30 = vmul.f32 %v523_v29, %v518_v28 }
 0x28c   :  { %532 = vst.msk [vmem:[#allocation4] sm:$0xff] %vm160_vm6, %v530_v30 }
 0x28d   :  { %739 = shalt.err (!%p736_p9)
}
 0x28e   :  { %557 = dma.vmem_to_hbm [thread:$0]  %s552_s27, 256, %s1024_s13, [#allocation5], %s757_s9, %s757_s9, %s758_s23  }
 0x28f   :  { %748 = dma.done.wait [#allocation3], 256  }
 0x290   :  { %749 = vsyncadd [#allocation3], 4294967040 }
 0x291   :  { %750 = dma.done.wait [#allocation5], 256  }
 0x292   :  { %751 = vsyncadd [#allocation5], 4294967040 }
 0x293   :  { %564 = vsyncpa [#allocation3], 1 }
 0x294   :  { %565 = vsyncpa [#allocation5], 1 }

</bundles_post_ra>
